<compile_context>
chip_gen: v7x
topology: tpu7x:2x2x1
jax: 0.10.0
libtpu: 0.0.40
codegen_flags: <defaults>
</compile_context>

<pallas_src>
import jax
import jax.numpy as jnp
from jax.experimental import pallas as pl
from jax.experimental.pallas import tpu as pltpu


def _patch_embed_kernel(p_ref, w_ref, b_ref, o_ref):
    # p_ref: (TN, K)  bf16 patch-row tile
    # w_ref: (K, E)   bf16 projection weight (VMEM-resident across the grid)
    # b_ref: (1, E)   f32 bias
    # o_ref: (TN, E)  output tile (bf16 by default)
    acc = jnp.dot(p_ref[...], w_ref[...], preferred_element_type=jnp.float32)
    o_ref[...] = (acc + b_ref[...]).astype(o_ref.dtype)


def _pick_row_tile(rows: int) -> int:
    """Row-tile size: multiple of 8 (or the full extent), <= 512, preferring an
    exact divisor of `rows` and >= 4 grid steps (>= 2 per v7x TensorCore)."""
    if rows <= 32:
        return rows                       # single full-extent block (always legal)
    cap = min(rows, 512)
    divisors = [t for t in range(8, cap + 1, 8) if rows % t == 0]
    deep = [t for t in divisors if rows // t >= 4]
    if deep:
        return max(deep)
    if divisors:
        return max(divisors)
    # No clean divisor: aim for ~4 steps; Pallas handles the partial last block.
    return max(8, min(512, ((rows + 3) // 4 + 7) // 8 * 8))


def patch_embed_forward(x, weight, bias, *, patch_size, out_dtype=jnp.bfloat16):
    """x: (B, C, H, W); weight: (E, C, P, P) [PyTorch Conv2d layout]; bias: (E,)."""
    B, C, H, W = x.shape
    P = patch_size
    assert H % P == 0 and W % P == 0, "image size must be divisible by patch size"
    Hp, Wp = H // P, W // P
    n_patches = Hp * Wp
    E = weight.shape[0]
    K = C * P * P
    rows = B * n_patches

    # Lane-dense output: pad E up to a multiple of 128 (zeros), slice afterwards.
    E_pad = max(128, ((E + 127) // 128) * 128)

    # ---- im2col: ONE fused transpose + bf16 convert pass in XLA ----
    # (B, C, Hp, P, Wp, P) -> (B, Hp, Wp, C, P, P) -> (B*n_patches, C*P*P)
    # Flatten order (c, kh, kw) matches conv_weight.reshape(E, C*P*P).
    patches = (x.reshape(B, C, Hp, P, Wp, P)
                 .transpose(0, 2, 4, 1, 3, 5)
                 .reshape(rows, K)
                 .astype(jnp.bfloat16))

    w_mat = weight.reshape(E, K).T.astype(jnp.bfloat16)              # (K, E)
    b_row = bias.astype(jnp.float32).reshape(1, E)
    if E_pad != E:
        w_mat = jnp.pad(w_mat, ((0, 0), (0, E_pad - E)))
        b_row = jnp.pad(b_row, ((0, 0), (0, E_pad - E)))

    tn = _pick_row_tile(rows)
    grid = (pl.cdiv(rows, tn),)

    # Right-sized VMEM budget: double-buffered activation/output tiles + weight.
    out_isz = jnp.dtype(out_dtype).itemsize
    footprint = (2 * tn * K * 2 + 2 * tn * E_pad * out_isz
                 + 2 * K * E_pad * 2 + 2 * E_pad * 4)
    vmem_limit = int(min(max(2 * footprint, 8 * 1024 * 1024), 48 * 1024 * 1024))

    out = pl.pallas_call(
        _patch_embed_kernel,
        out_shape=jax.ShapeDtypeStruct((rows, E_pad), out_dtype),
        grid_spec=pltpu.PrefetchScalarGridSpec(
            num_scalar_prefetch=0,
            grid=grid,
            in_specs=[
                pl.BlockSpec((tn, K), lambda i: (i, 0)),         # patch rows
                pl.BlockSpec((K, E_pad), lambda i: (0, 0)),      # weight (resident)
                pl.BlockSpec((1, E_pad), lambda i: (0, 0)),      # bias   (resident)
            ],
            out_specs=pl.BlockSpec((tn, E_pad), lambda i: (i, 0)),
        ),
        compiler_params=pltpu.CompilerParams(
            dimension_semantics=("parallel",),
            vmem_limit_bytes=vmem_limit,
        ),
    )(patches, w_mat, b_row)

    out = out.reshape(B, n_patches, E_pad)
    return out[:, :, :E] if E_pad != E else out


def patch_embed_reference(x, weight, bias, *, patch_size):
    """Pure-JAX reference mirroring the PyTorch forward (f32 conv)."""
    out = jax.lax.conv_general_dilated(
        x.astype(jnp.float32), weight.astype(jnp.float32),
        window_strides=(patch_size, patch_size), padding="VALID",
        dimension_numbers=("NCHW", "OIHW", "NCHW"))
    out = out + bias.astype(jnp.float32).reshape(1, -1, 1, 1)
    B, E, Hp, Wp = out.shape
    return out.reshape(B, E, Hp * Wp).transpose(0, 2, 1)             # (B, N, E)


if __name__ == "__main__":
    key = jax.random.PRNGKey(0)

    configs = [
        dict(B=2, C=3, img=32, P=8, E=128),    # small smoke test (lane-dense E)
        dict(B=2, C=3, img=224, P=16, E=768),  # ViT-B/16 module defaults
        dict(B=1, C=3, img=112, P=16, E=64),   # ragged row tiling + E<128 pad path
    ]

    for cfg in configs:
        key, kx, kw, kb = jax.random.split(key, 4)
        x = jax.random.normal(kx, (cfg["B"], cfg["C"], cfg["img"], cfg["img"]),
                              jnp.float32)
        w = 0.02 * jax.random.normal(kw, (cfg["E"], cfg["C"], cfg["P"], cfg["P"]),
                                     jnp.float32)
        b = 0.01 * jax.random.normal(kb, (cfg["E"],), jnp.float32)

        out = patch_embed_forward(x, w, b, patch_size=cfg["P"])
        out = jax.block_until_ready(out)
        ref = patch_embed_reference(x, w, b, patch_size=cfg["P"])

        n_patches = (cfg["img"] // cfg["P"]) ** 2
        assert out.shape == (cfg["B"], n_patches, cfg["E"])
        out_f32 = out.astype(jnp.float32)
        max_err = float(jnp.max(jnp.abs(out_f32 - ref)))
        # bf16 matmul operands + bf16 output, accumulation in f32.
        assert jnp.allclose(out_f32, ref, rtol=3e-2, atol=3e-2), (
            f"mismatch for cfg={cfg}: max abs err {max_err}")

    print("KERNEL_OK")
</pallas_src>

<mosaic_0001>
module attributes {stable_mosaic.version = 11 : i64} {
  func.func @_patch_embed_kernel(%arg0: i32, %arg1: memref<32x192xbf16, #tpu.memory_space<vmem>>, %arg2: memref<192x128xbf16, #tpu.memory_space<vmem>>, %arg3: memref<1x128xf32, #tpu.memory_space<vmem>>, %arg4: memref<32x128xbf16, #tpu.memory_space<vmem>>) attributes {dimension_semantics = [#tpu.dimension_semantics<parallel>], iteration_bounds = array<i64: 1>, scalar_prefetch = 0 : i64, scratch_operands = 0 : i64, tpu.core_type = #tpu.core_type<tc>, window_params = [{transform_indices = @transform_0, window_bounds = array<i64: 32, 192>}, {pipeline_mode = #tpu.pipeline_mode<synchronous>, transform_indices = @transform_1, window_bounds = array<i64: 192, 128>}, {pipeline_mode = #tpu.pipeline_mode<synchronous>, transform_indices = @transform_2, window_bounds = array<i64: 1, 128>}, {transform_indices = @transform_3, window_bounds = array<i64: 32, 128>}]} {
    %c0 = arith.constant 0 : index
    %c0_0 = arith.constant 0 : index
    %0 = vector.load %arg1[%c0, %c0_0] : memref<32x192xbf16, #tpu.memory_space<vmem>>, vector<32x192xbf16>
    %c0_1 = arith.constant 0 : index
    %c0_2 = arith.constant 0 : index
    %1 = vector.load %arg2[%c0_1, %c0_2] : memref<192x128xbf16, #tpu.memory_space<vmem>>, vector<192x128xbf16>
    %cst = arith.constant dense<0.000000e+00> : vector<32x128xf32>
    %2 = tpu.matmul %0, %1, %cst {dimension_numbers = #tpu.dot_dimension_numbers<[1], [0], [0], [1], [0, 0, 1, 1], [], []>} : vector<32x192xbf16>, vector<192x128xbf16>, vector<32x128xf32> -> vector<32x128xf32>
    %c0_3 = arith.constant 0 : index
    %c0_4 = arith.constant 0 : index
    %3 = vector.load %arg3[%c0_3, %c0_4] : memref<1x128xf32, #tpu.memory_space<vmem>>, vector<1x128xf32>
    %4 = vector.broadcast %3 : vector<1x128xf32> to vector<32x128xf32>
    %5 = arith.addf %2, %4 : vector<32x128xf32>
    %6 = arith.truncf %5 : vector<32x128xf32> to vector<32x128xbf16>
    %c0_5 = arith.constant 0 : index
    %c0_6 = arith.constant 0 : index
    %7 = vector.load %arg4[%c0_5, %c0_6] : memref<32x128xbf16, #tpu.memory_space<vmem>>, vector<32x128xbf16>
    tpu.vector_store %arg4[%c0_5, %c0_6], %6 {strides = array<i32>} : memref<32x128xbf16, #tpu.memory_space<vmem>>, vector<32x128xbf16>,
    return
  }
  func.func @transform_0(%arg0: i32) -> (i32, i32) {
    %c0_i32 = arith.constant 0 : i32
    %c0_i32_0 = arith.constant 0 : i32
    return %arg0, %c0_i32 : i32, i32
  }
  func.func @transform_1(%arg0: i32) -> (i32, i32) {
    %c0_i32 = arith.constant 0 : i32
    %c0_i32_0 = arith.constant 0 : i32
    %c0_i32_1 = arith.constant 0 : i32
    return %c0_i32, %c0_i32_0 : i32, i32
  }
  func.func @transform_2(%arg0: i32) -> (i32, i32) {
    %c0_i32 = arith.constant 0 : i32
    %c0_i32_0 = arith.constant 0 : i32
    %c0_i32_1 = arith.constant 0 : i32
    return %c0_i32, %c0_i32_0 : i32, i32
  }
  func.func @transform_3(%arg0: i32) -> (i32, i32) {
    %c0_i32 = arith.constant 0 : i32
    %c0_i32_0 = arith.constant 0 : i32
    return %arg0, %c0_i32 : i32, i32
  }
}

</mosaic_0001>

<bundles_post_ra>
// kernel: tpu_custom_call.1
= control target key start
LH: loop header
LB: loop body
LE: loop exit
PB: predicated region body
PF: predicated region fallthrough
CT: control target
= control target key end

     0   :  { %8 = vsyncpa [#allocation3], 0  ;;  %s496_s0 = inlined_call_operand.hbm [shape: bf16[32,192], index: 0, kind: input, shape index: {}]   ;;  %s497_s1 = inlined_call_operand.hbm [shape: bf16[192,128], index: 1, kind: input, shape index: {}]   ;;  %s498_s2 = inlined_call_operand.vmem [shape: f32[1,128], index: 2, kind: input, shape index: {}]   ;;  %s499_s3 = inlined_call_operand.hbm [shape: bf16[32,128], index: 3, kind: output, shape index: {}]  }
   0x1   :  { %9 = vsyncpa [#allocation6], 0 }
   0x2   :  { %10 = vsyncpa [#allocation4], 0  ;;  %s423_s12 = smov [#allocation2]   ;;  %s351_s16 = scalar_lea.hbm %s496_s0, 512 }
   0x3   :  { %s16_s13 = sshll.u32 %s423_s12, 4  ;;  %p352_p0 = scmp.ne.s32.totalorder %s496_s0, %s351_s16  ;;  %s17_s13 = int_to_ptr.vmem [resolvable:$true] %s16_s13 }
   0x4   :  { %p355_p1 = scmp.lt.u32.totalorder %s351_s16, %s496_s0 }
   0x6   :  { %p357_p2 = pnand %p355_p1, %p352_p0 }
   0x8   :  { %360 = shalt.err (!%p357_p2)
}
   0x9   :  { %s361_s21 = scalar_lea.vmem %s17_s13, 512  ;;  %p366_p4 = scmp.lt.s32.totalorder %s17_s13, %s17_s13 }
   0xa   :  { %p362_p3 = scmp.ne.s32.totalorder %s17_s13, %s361_s21  ;;  %p367_p5 = scmp.lt.s32.totalorder %s361_s21, %s361_s21 }
   0xc   :  { %p368_p6 = por %p367_p5, %p366_p4 }
   0xe   :  { %p369_p7 = pnand %p368_p6, %p362_p3 }
  0x10   :  { %372 = shalt.err (!%p369_p7)
}
  0x11   :  { %s424_s22 = smov 128   ;;  %s425_s23 = smov 8  }
  0x12   :  { %22 = dma.hbm_to_vmem [thread:$0]  %s496_s0, 512, %s17_s13, [#allocation3], %s424_s22, %s424_s22, %s425_s23  }
  0x13   :  { %s426_s26 = smov [#allocation5]   ;;  %s373_s30 = scalar_lea.hbm %s497_s1, 1536 }
  0x14   :  { %s28_s27 = sshll.u32 %s426_s26, 4  ;;  %p374_p8 = scmp.ne.s32.totalorder %s497_s1, %s373_s30  ;;  %s29_s27 = int_to_ptr.vmem [resolvable:$true] %s28_s27 }
  0x15   :  { %p377_p9 = scmp.lt.u32.totalorder %s373_s30, %s497_s1 }
  0x17   :  { %p379_p10 = pnand %p377_p9, %p374_p8 }
  0x19   :  { %382 = shalt.err (!%p379_p10)
}
  0x1a   :  { %s383_s8 = scalar_lea.vmem %s29_s27, 1536  ;;  %p388_p12 = scmp.lt.s32.totalorder %s29_s27, %s29_s27 }
  0x1b   :  { %p384_p11 = scmp.ne.s32.totalorder %s29_s27, %s383_s8  ;;  %p389_p13 = scmp.lt.s32.totalorder %s383_s8, %s383_s8 }
  0x1d   :  { %p390_p0 = por %p389_p13, %p388_p12 }
  0x1f   :  { %p391_p1 = pnand %p390_p0, %p384_p11 }
  0x21   :  { %394 = shalt.err (!%p391_p1)
}
  0x22   :  { %s427_s0 = smov 64   ;;  %s428_s9 = smov 4  }
  0x23   :  { %34 = dma.hbm_to_vmem [thread:$0]  %s497_s1, 1536, %s29_s27, [#allocation6], %s427_s0, %s427_s0, %s428_s9  }
  0x24   :  { %417 = dma.done.wait [#allocation3], 512  }
  0x25   :  { %418 = vsyncadd [#allocation3], 4294966784 }
  0x26   :  { %419 = dma.done.wait [#allocation6], 1536  }
  0x27   :  { %420 = vsyncadd [#allocation6], 4294965760  ;;  %v429_v0 = vmov 0   ;;  %v333_v1 = vld [vmem:[#allocation5] sm:$0xff]   ;;  %v334_v2 = vld [vmem:[#allocation5 + $0x8] sm:$0xff]   ;;  %vm169_vm0 = vcmask 523264  }
  0x28   :  { %176 = vmatprep.subr.bf16.mxu0 %v429_v0  ;;  %301 = vmatprep.subr.bf16.mxu1 %v429_v0  ;;  %v335_v3 = vld [vmem:[#allocation5 + $0x10] sm:$0xff]   ;;  %v336_v4 = vld [vmem:[#allocation5 + $0x18] sm:$0xff]   ;;  %v347_v5 = vld [vmem:[#allocation2 + $0x4] ss:$8 sps:$4 sm:$0xff]   ;;  %s430_s13 = smov [#allocation7]  }
  0x29   :  { %177 = vmatpush1.bf16.msra.mxu0 %v333_v1  ;;  %313 = vmatpush1.bf16.msra.mxu1 %v333_v1  ;;  %v337_v6 = vld [vmem:[#allocation5 + $0x20] sm:$0xff]   ;;  %v350_v7 = vld [vmem:[#allocation2 + $0x14] ss:$8 sps:$4 sm:$0xff]   ;;  %v338_v8 = vld [vmem:[#allocation5 + $0x28] sm:$0xff]   ;;  %s250_s14 = sshll.u32 %s430_s13, 4  ;;  %s251_s14 = int_to_ptr.vmem [resolvable:$true] %s250_s14 }
  0x2a   :  { %178 = vmatprep.subr.bf16.mxu0 %v429_v0  ;;  %302 = vmatprep.subr.bf16.mxu1 %v429_v0  ;;  %v339_v9 = vld [vmem:[#allocation5 + $0x30] sm:$0xff]   ;;  %v340_v10 = vld [vmem:[#allocation5 + $0x38] sm:$0xff]   ;;  %v341_v11 = vld [vmem:[#allocation5 + $0x40] sm:$0xff]   ;;  %p400_p3 = scmp.lt.s32.totalorder %s251_s14, %s251_s14 }
  0x2b   :  { %280 = vmatprep.mubr.msk.bf16.mxu0 %vm169_vm0, %v347_v5  ;;  %281 = vmatprep.mubr.msk.bf16.mxu1 %vm169_vm0, %v350_v7  ;;  %v342_v12 = vld [vmem:[#allocation5 + $0x48] sm:$0xff]   ;;  %v343_v13 = vld [vmem:[#allocation5 + $0x50] sm:$0xff]   ;;  %v344_v14 = vld [vmem:[#allocation5 + $0x58] sm:$0xff]  }
  0x2c   :  { %v345_v15 = vld [vmem:[#allocation2] ss:$8 sps:$4 sm:$0xff]   ;;  %v348_v16 = vld [vmem:[#allocation2 + $0x10] ss:$8 sps:$4 sm:$0xff]  }
  0x2d   :  { %179 = vmatpush1.bf16.msra.mxu0 %v334_v2  ;;  %314 = vmatpush1.bf16.msra.mxu1 %v334_v2  ;;  %v263_v17 = vld [vmem:[%s498_s2] ss:$0 sm:$0xff]  ;;  %s395_s2 = scalar_lea.vmem %s251_s14, 256 }
  0x2e   :  { %180 = vmatprep.subr.bf16.mxu0 %v429_v0  ;;  %303 = vmatprep.subr.bf16.mxu1 %v429_v0  ;;  %p396_p2 = scmp.ne.s32.totalorder %s251_s14, %s395_s2  ;;  %p401_p4 = scmp.lt.s32.totalorder %s395_s2, %s395_s2 }
  0x30   :  { %p402_p5 = por %p401_p4, %p400_p3 }
  0x31   :  { %181 = vmatpush1.bf16.msra.mxu0 %v335_v3  ;;  %315 = vmatpush1.bf16.msra.mxu1 %v335_v3 }
  0x32   :  { %182 = vmatprep.subr.bf16.mxu0 %v429_v0  ;;  %304 = vmatprep.subr.bf16.mxu1 %v429_v0  ;;  %p403_p6 = pnand %p402_p5, %p396_p2 }
  0x35   :  { %183 = vmatpush1.bf16.msra.mxu0 %v336_v4  ;;  %316 = vmatpush1.bf16.msra.mxu1 %v336_v4 }
  0x36   :  { %184 = vmatprep.subr.bf16.mxu0 %v429_v0  ;;  %305 = vmatprep.subr.bf16.mxu1 %v429_v0 }
  0x39   :  { %185 = vmatpush1.bf16.msra.mxu0 %v337_v6  ;;  %317 = vmatpush1.bf16.msra.mxu1 %v337_v6 }
  0x3a   :  { %186 = vmatprep.subr.bf16.mxu0 %v429_v0  ;;  %306 = vmatprep.subr.bf16.mxu1 %v429_v0 }
  0x3d   :  { %187 = vmatpush1.bf16.msra.mxu0 %v338_v8  ;;  %318 = vmatpush1.bf16.msra.mxu1 %v338_v8 }
  0x3e   :  { %188 = vmatprep.subr.bf16.mxu0 %v429_v0  ;;  %307 = vmatprep.subr.bf16.mxu1 %v429_v0 }
  0x41   :  { %189 = vmatpush1.bf16.msra.mxu0 %v339_v9  ;;  %319 = vmatpush1.bf16.msra.mxu1 %v339_v9 }
  0x42   :  { %190 = vmatprep.subr.bf16.mxu0 %v429_v0  ;;  %308 = vmatprep.subr.bf16.mxu1 %v429_v0 }
  0x45   :  { %191 = vmatpush1.bf16.msra.mxu0 %v340_v10  ;;  %320 = vmatpush1.bf16.msra.mxu1 %v340_v10 }
  0x46   :  { %192 = vmatprep.subr.bf16.mxu0 %v429_v0  ;;  %309 = vmatprep.subr.bf16.mxu1 %v429_v0 }
  0x49   :  { %193 = vmatpush1.bf16.msra.mxu0 %v341_v11  ;;  %321 = vmatpush1.bf16.msra.mxu1 %v341_v11 }
  0x4a   :  { %194 = vmatprep.subr.bf16.mxu0 %v429_v0  ;;  %310 = vmatprep.subr.bf16.mxu1 %v429_v0 }
  0x4d   :  { %195 = vmatpush1.bf16.msra.mxu0 %v342_v12  ;;  %322 = vmatpush1.bf16.msra.mxu1 %v342_v12 }
  0x4e   :  { %196 = vmatprep.subr.bf16.mxu0 %v429_v0  ;;  %311 = vmatprep.subr.bf16.mxu1 %v429_v0 }
  0x51   :  { %197 = vmatpush1.bf16.msra.mxu0 %v343_v13  ;;  %323 = vmatpush1.bf16.msra.mxu1 %v343_v13 }
  0x52   :  { %198 = vmatprep.subr.bf16.mxu0 %v429_v0  ;;  %312 = vmatprep.subr.bf16.mxu1 %v429_v0 }
  0x55   :  { %199 = vmatpush1.bf16.msra.mxu0 %v344_v14  ;;  %324 = vmatpush1.bf16.msra.mxu1 %v344_v14 }
  0x58   :  { %209 = vmatmul.mubr.bf16.vlgmr.msra.gmra.mrb[0].mxu0 %v345_v15  ;;  %217 = vmatmul.mubr.bf16.vlgmr.msra.gmra.mrb[0].mxu1 %v348_v16 }
 0x12b   :  { %v210_v18 = vpop.f32.mrb[0].mxu0  ;;  %v218_v19 = vpop.f32.mrb[0].mxu1 }
 0x12c   :  { %v212_v20 = vpop.f32.mrb[1].mxu0  ;;  %v220_v21 = vpop.f32.mrb[1].mxu1  ;;  %v211_v24 = vadd.f32 %v263_v17, %v210_v18  ;;  %v219_v25 = vadd.f32 %v263_v17, %v218_v19 }
 0x12d   :  { %v213_v22 = vpop.f32.mrb[2].mxu0  ;;  %v221_v23 = vpop.f32.mrb[2].mxu1 }
 0x12e   :  { %v214_v26 = vadd.f32 %v263_v17, %v213_v22  ;;  %v222_v27 = vadd.f32 %v263_v17, %v221_v23  ;;  %v215_v28 = vpop.f32.mrb[3].mxu0  ;;  %v223_v29 = vpop.f32.mrb[3].mxu1 }
 0x130   :  { %v293_v30 = vpack.c.bf16 %v214_v26, %v211_v24  ;;  %v298_v31 = vpack.c.bf16 %v222_v27, %v219_v25 }
 0x132   :  { %294 = vst [vmem:[#allocation7] sm:$0xff] %v293_v30   ;;  %300 = vst [vmem:[#allocation7 + $0x8] sm:$0xff] %v298_v31  }
 0x133   :  { %406 = shalt.err (!%p403_p6)
}
 0x134   :  { %s407_s17 = scalar_lea.hbm %s499_s3, 256 }
 0x135   :  { %p408_p7 = scmp.ne.s32.totalorder %s499_s3, %s407_s17  ;;  %p411_p8 = scmp.lt.u32.totalorder %s407_s17, %s499_s3 }
 0x137   :  { %p413_p9 = pnand %p411_p8, %p408_p7 }
 0x139   :  { %416 = shalt.err (!%p413_p9)
}
 0x13a   :  { %256 = dma.vmem_to_hbm [thread:$0]  %s251_s14, 256, %s499_s3, [#allocation4], %s427_s0, %s427_s0, %s428_s9  }
 0x13b   :  { %421 = dma.done.wait [#allocation4], 256  }
 0x13c   :  { %422 = vsyncadd [#allocation4], 4294967040 }
 0x13d   :  { %260 = vsyncpa [#allocation3], 1 }
 0x13e   :  { %261 = vsyncpa [#allocation6], 1 }
 0x13f   :  { %262 = vsyncpa [#allocation4], 1 }

</bundles_post_ra>
